<compile_context>
chip_gen: v5e
topology: v5e:2x2
jax: 0.10.0
libtpu: 0.0.40
codegen_flags: <defaults>
</compile_context>

<pallas_src>
import functools

import jax
import jax.numpy as jnp
from jax.experimental import pallas as pl
from jax.experimental.pallas import tpu as pltpu

_NEG = -3.0e38          # finite "-inf" sentinel / masking bias for running max
_LANE = 128
_MAX_E_TILE = 512


def _round_up(v, m):
    return ((v + m - 1) // m) * m


def _edgeconv_kernel(*refs, fuse_norm, n_valid_feat):
    """One EdgeConv (max aggregation), optionally fused with LayerNorm + PReLU.

    Grid: (num_edge_tiles,) -- sequential reduction over edge tiles.
    Refs in order:
      x_ref      [N, C]    node features (f32)
      s_src_ref  [Te, N]   one-hot of edge sources             (bf16, 0/1)
      s_dst_ref  [N, Te]   one-hot of edge targets, transposed (bf16, 0/1)
      wa_ref     [C, F]    W_i - W_j  (reassociated weights)
      wb_ref     [C, F]    W_j
      b_ref      [1, F]    bias
      [ln_g_ref, ln_b_ref [1, F], a_ref SMEM (1,)]   only if fuse_norm
      out_ref    [N, F]
      scratch:   xwa [N, F], xwb [N, F], acc [N, F], cnt [N, 1]  (f32 VMEM)
    """
    if fuse_norm:
        (x_ref, s_src_ref, s_dst_ref, wa_ref, wb_ref, b_ref,
         ln_g_ref, ln_b_ref, a_ref, out_ref, xwa, xwb, acc, cnt) = refs
    else:
        (x_ref, s_src_ref, s_dst_ref, wa_ref, wb_ref, b_ref,
         out_ref, xwa, xwb, acc, cnt) = refs

    step = pl.program_id(0)
    n_steps = pl.num_programs(0)

    @pl.when(step == 0)
    def _init():
        x = x_ref[...]                                          # [N, C]
        xwa[...] = jnp.dot(x, wa_ref[...], preferred_element_type=jnp.float32)
        xwb[...] = jnp.dot(x, wb_ref[...], preferred_element_type=jnp.float32)
        acc[...] = jnp.full(acc.shape, _NEG, jnp.float32)
        cnt[...] = jnp.zeros(cnt.shape, jnp.float32)

    # Source-side gather for this edge tile (single MXU matmul; the dst term is
    # constant under the per-dst max and is added back at finalisation).
    s_src = s_src_ref[...].astype(jnp.float32)                  # [Te, N]
    g = jnp.dot(s_src, xwb[...], preferred_element_type=jnp.float32)  # [Te, F]

    # Running scatter-max of this edge tile into the per-node accumulator.
    # Additive masking: bias is 0 where (node, edge) match, -BIG otherwise, so
    # the [N, Te, F] candidate tensor needs only add + max (no compare/select).
    dst_mask = s_dst_ref[...].astype(jnp.float32)               # [N, Te]
    cnt[...] = cnt[...] + jnp.sum(dst_mask, axis=1, keepdims=True)
    neg_bias = (1.0 - dst_mask) * _NEG                          # {0, -BIG}
    cand = g[None, :, :] + neg_bias[:, :, None]                 # [N, Te, F]
    acc[...] = jnp.maximum(acc[...], jnp.max(cand, axis=1))     # [N, F]

    @pl.when(step == n_steps - 1)
    def _finalize():
        has_in = cnt[...] > 0.0                 # [N, 1]: node has >= 1 in-edge
        y = jnp.where(has_in, xwa[...] + b_ref[...] + acc[...], 0.0)
        if fuse_norm:
            f = y.shape[-1]
            col_ok = (jax.lax.broadcasted_iota(jnp.int32, (1, f), 1)
                      < n_valid_feat).astype(jnp.float32)
            inv_n = jnp.float32(1.0 / n_valid_feat)
            mu = jnp.sum(y * col_ok, axis=-1, keepdims=True) * inv_n
            d = (y - mu) * col_ok
            var = jnp.sum(d * d, axis=-1, keepdims=True) * inv_n
            yn = d * jax.lax.rsqrt(var + 1e-5) * ln_g_ref[...] + ln_b_ref[...]
            yn = yn * col_ok                    # keep padded lanes exactly 0
            a = a_ref[0]                        # PReLU slope (SMEM scalar)
            y = jnp.where(yn > 0.0, yn, a * yn)
        out_ref[...] = y.astype(out_ref.dtype)


def _edgeconv_call(x, s_src, s_dst_t, wa, wb, b, e_tile, *, norm=None):
    """One pallas_call: EdgeConv (optionally fused with LayerNorm + PReLU)."""
    n_pad = x.shape[0]
    f_pad = wa.shape[1]
    e_pad = s_src.shape[0]
    n_tiles = e_pad // e_tile

    def row_spec(shape):
        return pl.BlockSpec(shape, lambda e: (0, 0))

    in_specs = [
        row_spec(x.shape),                                   # x  (resident)
        pl.BlockSpec((e_tile, n_pad), lambda e: (e, 0)),     # s_src tile
        pl.BlockSpec((n_pad, e_tile), lambda e: (0, e)),     # s_dst^T tile
        row_spec(wa.shape), row_spec(wb.shape), row_spec(b.shape),
    ]
    args = [x, s_src, s_dst_t, wa, wb, b]

    if norm is not None:
        ln_g, ln_b, a, hid_valid = norm
        in_specs += [row_spec(ln_g.shape), row_spec(ln_b.shape),
                     pl.BlockSpec(memory_space=pltpu.MemorySpace.SMEM)]
        args += [ln_g, ln_b, a]
        kernel = functools.partial(_edgeconv_kernel, fuse_norm=True,
                                   n_valid_feat=hid_valid)
    else:
        kernel = functools.partial(_edgeconv_kernel, fuse_norm=False,
                                   n_valid_feat=f_pad)

    return pl.pallas_call(
        kernel,
        out_shape=jax.ShapeDtypeStruct((n_pad, f_pad), jnp.float32),
        grid=(n_tiles,),
        in_specs=in_specs,
        out_specs=pl.BlockSpec((n_pad, f_pad), lambda e: (0, 0)),
        scratch_shapes=[pltpu.VMEM((n_pad, f_pad), jnp.float32),   # xwa
                        pltpu.VMEM((n_pad, f_pad), jnp.float32),   # xwb
                        pltpu.VMEM((n_pad, f_pad), jnp.float32),   # acc
                        pltpu.VMEM((n_pad, 1), jnp.float32)],      # in-degree
        compiler_params=pltpu.CompilerParams(
            dimension_semantics=("arbitrary",),
            vmem_limit_bytes=32 * 1024 * 1024),
    )(*args)


def edge_block(x, edge_index, params):
    """x: [N, Cin] f32; edge_index: [2, E] int32 (row 0 = src j, row 1 = dst i)."""
    n, cin = x.shape
    e = edge_index.shape[1]
    src, dst = edge_index[0], edge_index[1]

    w1, b1 = params["w1"], params["b1"]       # [2*Cin, H], [H]
    w2, b2 = params["w2"], params["b2"]       # [2*H, Cout], [Cout]
    hid, cout = w1.shape[1], w2.shape[1]

    # Padded sizes: nodes -> multiple of 8 (sublanes), features -> 128 lanes.
    n_pad = _round_up(n, 8)
    h_pad = _round_up(hid, _LANE)
    c_pad = _round_up(cout, _LANE)
    if e <= _MAX_E_TILE:
        e_tile = _round_up(e, 8)
        e_pad = e_tile
    else:
        e_tile = _MAX_E_TILE
        e_pad = _round_up(e, e_tile)

    def pad2(a, r, c):
        return jnp.pad(a, ((0, r - a.shape[0]), (0, c - a.shape[1])))

    # Dense one-hot gather/scatter operands, stored as bf16 (0/1 exact).
    # Padded edges are all-zero rows/columns => never selected, never gathered.
    node_ids = jnp.arange(n_pad, dtype=edge_index.dtype)
    s_src = (src[:, None] == node_ids[None, :]).astype(jnp.bfloat16)    # [E, Np]
    s_src = jnp.pad(s_src, ((0, e_pad - e), (0, 0)))
    s_dst_t = (dst[None, :] == node_ids[:, None]).astype(jnp.bfloat16)  # [Np, E]
    s_dst_t = jnp.pad(s_dst_t, ((0, 0), (0, e_pad - e)))

    x_p = pad2(x.astype(jnp.float32), n_pad, cin)

    # Reassociated weights: Linear([x_i, x_j-x_i]) = x_i@(W_i-W_j) + x_j@W_j + b
    wa1 = pad2(w1[:cin] - w1[cin:], cin, h_pad)
    wb1 = pad2(w1[cin:], cin, h_pad)
    b1p = jnp.pad(b1, (0, h_pad - hid)).reshape(1, h_pad)
    ln_g = jnp.pad(params["ln_g"], (0, h_pad - hid)).reshape(1, h_pad)
    ln_b = jnp.pad(params["ln_b"], (0, h_pad - hid)).reshape(1, h_pad)
    a = jnp.asarray(params["prelu_a"], jnp.float32).reshape(1)

    wa2 = pad2(w2[:hid] - w2[hid:], h_pad, c_pad)
    wb2 = pad2(w2[hid:], h_pad, c_pad)
    b2p = jnp.pad(b2, (0, c_pad - cout)).reshape(1, c_pad)

    # EdgeConv1 + LayerNorm + PReLU (fused finalize), then EdgeConv2.
    y = _edgeconv_call(x_p, s_src, s_dst_t, wa1, wb1, b1p, e_tile,
                       norm=(ln_g, ln_b, a, hid))
    out = _edgeconv_call(y, s_src, s_dst_t, wa2, wb2, b2p, e_tile, norm=None)
    return out[:n, :cout]


def edge_block_reference(x, edge_index, params):
    src, dst = edge_index[0], edge_index[1]

    def edgeconv(feat, w, b):
        xi, xj = feat[dst], feat[src]
        m = jnp.concatenate([xi, xj - xi], axis=-1) @ w + b
        out = jnp.full((feat.shape[0], w.shape[1]), -jnp.inf, jnp.float32)
        out = out.at[dst].max(m)
        return jnp.where(jnp.isfinite(out), out, 0.0)

    h = edgeconv(x, params["w1"], params["b1"])
    mu = h.mean(-1, keepdims=True)
    var = ((h - mu) ** 2).mean(-1, keepdims=True)
    h = (h - mu) / jnp.sqrt(var + 1e-5) * params["ln_g"] + params["ln_b"]
    h = jnp.where(h > 0, h, params["prelu_a"] * h)
    return edgeconv(h, params["w2"], params["b2"])


def make_params(key, in_c, hid_c, out_c):
    k1, k2, k3, k4 = jax.random.split(key, 4)
    scale1 = 1.0 / jnp.sqrt(2.0 * in_c)
    scale2 = 1.0 / jnp.sqrt(2.0 * hid_c)
    return {
        "w1": jax.random.uniform(k1, (2 * in_c, hid_c), jnp.float32, -scale1, scale1),
        "b1": jax.random.uniform(k2, (hid_c,), jnp.float32, -scale1, scale1),
        "w2": jax.random.uniform(k3, (2 * hid_c, out_c), jnp.float32, -scale2, scale2),
        "b2": jax.random.uniform(k4, (out_c,), jnp.float32, -scale2, scale2),
        "ln_g": jnp.ones((hid_c,), jnp.float32),
        "ln_b": jnp.zeros((hid_c,), jnp.float32),
        "prelu_a": jnp.float32(0.25),
    }


if __name__ == "__main__":
    # Small synthetic graph: N=8 nodes, C_in=4, hidden=32, C_out=16,
    # k=4 ring graph -> E=32 edges; every node has incoming edges.
    N, C_IN, HID, C_OUT, K = 8, 4, 32, 16, 4

    key = jax.random.PRNGKey(0)
    kx, kp = jax.random.split(key)
    x = jax.random.normal(kx, (N, C_IN), jnp.float32)

    dst = jnp.repeat(jnp.arange(N, dtype=jnp.int32), K)
    off = jnp.tile(jnp.arange(1, K + 1, dtype=jnp.int32), N)
    src = (dst + off) % N
    edge_index = jnp.stack([src, dst], axis=0)          # [2, E], row0=src, row1=dst

    params = make_params(kp, C_IN, HID, C_OUT)

    out = jax.block_until_ready(edge_block(x, edge_index, params))

    ref = edge_block_reference(x, edge_index, params)
    assert out.shape == (N, C_OUT)
    err = jnp.max(jnp.abs(out - ref))
    assert jnp.allclose(out, ref, atol=2e-4, rtol=2e-4), f"max abs err {err}"

    print("KERNEL_OK")
</pallas_src>

<mosaic_0001>
module attributes {stable_mosaic.version = 11 : i64} {
  func.func @_edgeconv_kernel(%arg0: i32, %arg1: memref<8x4xf32, #tpu.memory_space<vmem>>, %arg2: memref<32x8xbf16, #tpu.memory_space<vmem>>, %arg3: memref<8x32xbf16, #tpu.memory_space<vmem>>, %arg4: memref<4x128xf32, #tpu.memory_space<vmem>>, %arg5: memref<4x128xf32, #tpu.memory_space<vmem>>, %arg6: memref<1x128xf32, #tpu.memory_space<vmem>>, %arg7: memref<1x128xf32, #tpu.memory_space<vmem>>, %arg8: memref<1x128xf32, #tpu.memory_space<vmem>>, %arg9: memref<1xf32, #tpu.memory_space<smem>>, %arg10: memref<8x128xf32, #tpu.memory_space<vmem>>, %arg11: memref<8x128xf32, #tpu.memory_space<vmem>>, %arg12: memref<8x128xf32, #tpu.memory_space<vmem>>, %arg13: memref<8x128xf32, #tpu.memory_space<vmem>>, %arg14: memref<8x1xf32, #tpu.memory_space<vmem>>) attributes {dimension_semantics = [#tpu.dimension_semantics<arbitrary>], iteration_bounds = array<i64: 1>, scalar_prefetch = 0 : i64, scratch_operands = 4 : i64, tpu.core_type = #tpu.core_type<tc>, window_params = [{pipeline_mode = #tpu.pipeline_mode<synchronous>, transform_indices = @transform_0, window_bounds = array<i64: 8, 4>}, {transform_indices = @transform_1, window_bounds = array<i64: 32, 8>}, {transform_indices = @transform_2, window_bounds = array<i64: 8, 32>}, {pipeline_mode = #tpu.pipeline_mode<synchronous>, transform_indices = @transform_3, window_bounds = array<i64: 4, 128>}, {pipeline_mode = #tpu.pipeline_mode<synchronous>, transform_indices = @transform_4, window_bounds = array<i64: 4, 128>}, {pipeline_mode = #tpu.pipeline_mode<synchronous>, transform_indices = @transform_5, window_bounds = array<i64: 1, 128>}, {pipeline_mode = #tpu.pipeline_mode<synchronous>, transform_indices = @transform_6, window_bounds = array<i64: 1, 128>}, {pipeline_mode = #tpu.pipeline_mode<synchronous>, transform_indices = @transform_7, window_bounds = array<i64: 1, 128>}, {transform_indices = @transform_8, window_bounds = array<i64: 1>}, {pipeline_mode = #tpu.pipeline_mode<synchronous>, transform_indices = @transform_9, window_bounds = array<i64: 8, 128>}]} {
    %c0_i32 = arith.constant 0 : i32
    %0 = arith.cmpi eq, %arg0, %c0_i32 : i32
    %1 = arith.extui %0 : i1 to i32
    %c0_i32_0 = arith.constant 0 : i32
    %2 = arith.cmpi ne, %1, %c0_i32_0 : i32
    scf.if %2 {
      %c0_20 = arith.constant 0 : index
      %c0_21 = arith.constant 0 : index
      %30 = vector.load %arg1[%c0_20, %c0_21] : memref<8x4xf32, #tpu.memory_space<vmem>>, vector<8x4xf32>
      %c0_22 = arith.constant 0 : index
      %c0_23 = arith.constant 0 : index
      %31 = vector.load %arg4[%c0_22, %c0_23] : memref<4x128xf32, #tpu.memory_space<vmem>>, vector<4x128xf32>
      %cst_24 = arith.constant dense<0.000000e+00> : vector<8x128xf32>
      %32 = tpu.matmul %30, %31, %cst_24 {dimension_numbers = #tpu.dot_dimension_numbers<[1], [0], [0], [1], [0, 0, 1, 1], [], []>} : vector<8x4xf32>, vector<4x128xf32>, vector<8x128xf32> -> vector<8x128xf32>
      %c0_25 = arith.constant 0 : index
      %c0_26 = arith.constant 0 : index
      %33 = vector.load %arg11[%c0_25, %c0_26] : memref<8x128xf32, #tpu.memory_space<vmem>>, vector<8x128xf32>
      tpu.vector_store %arg11[%c0_25, %c0_26], %32 {strides = array<i32>} : memref<8x128xf32, #tpu.memory_space<vmem>>, vector<8x128xf32>,
      %c0_27 = arith.constant 0 : index
      %c0_28 = arith.constant 0 : index
      %34 = vector.load %arg5[%c0_27, %c0_28] : memref<4x128xf32, #tpu.memory_space<vmem>>, vector<4x128xf32>
      %cst_29 = arith.constant dense<0.000000e+00> : vector<8x128xf32>
      %35 = tpu.matmul %30, %34, %cst_29 {dimension_numbers = #tpu.dot_dimension_numbers<[1], [0], [0], [1], [0, 0, 1, 1], [], []>} : vector<8x4xf32>, vector<4x128xf32>, vector<8x128xf32> -> vector<8x128xf32>
      %c0_30 = arith.constant 0 : index
      %c0_31 = arith.constant 0 : index
      %36 = vector.load %arg12[%c0_30, %c0_31] : memref<8x128xf32, #tpu.memory_space<vmem>>, vector<8x128xf32>
      tpu.vector_store %arg12[%c0_30, %c0_31], %35 {strides = array<i32>} : memref<8x128xf32, #tpu.memory_space<vmem>>, vector<8x128xf32>,
      %cst_32 = arith.constant -3.000000e+38 : f32
      %37 = vector.broadcast %cst_32 : f32 to vector<8x128xf32>
      %c0_33 = arith.constant 0 : index
      %c0_34 = arith.constant 0 : index
      %38 = vector.load %arg13[%c0_33, %c0_34] : memref<8x128xf32, #tpu.memory_space<vmem>>, vector<8x128xf32>
      tpu.vector_store %arg13[%c0_33, %c0_34], %37 {strides = array<i32>} : memref<8x128xf32, #tpu.memory_space<vmem>>, vector<8x128xf32>,
      %cst_35 = arith.constant 0.000000e+00 : f32
      %39 = vector.broadcast %cst_35 : f32 to vector<8x1xf32>
      %c0_36 = arith.constant 0 : index
      %c0_37 = arith.constant 0 : index
      %40 = vector.load %arg14[%c0_36, %c0_37] : memref<8x1xf32, #tpu.memory_space<vmem>>, vector<8x1xf32>
      tpu.vector_store %arg14[%c0_36, %c0_37], %39 {strides = array<i32>} : memref<8x1xf32, #tpu.memory_space<vmem>>, vector<8x1xf32>,
    } else {
    }
    %c0 = arith.constant 0 : index
    %c0_1 = arith.constant 0 : index
    %3 = vector.load %arg2[%c0, %c0_1] : memref<32x8xbf16, #tpu.memory_space<vmem>>, vector<32x8xbf16>
    %4 = arith.extf %3 : vector<32x8xbf16> to vector<32x8xf32>
    %c0_2 = arith.constant 0 : index
    %c0_3 = arith.constant 0 : index
    %5 = vector.load %arg12[%c0_2, %c0_3] : memref<8x128xf32, #tpu.memory_space<vmem>>, vector<8x128xf32>
    %cst = arith.constant dense<0.000000e+00> : vector<32x128xf32>
    %6 = tpu.matmul %4, %5, %cst {dimension_numbers = #tpu.dot_dimension_numbers<[1], [0], [0], [1], [0, 0, 1, 1], [], []>} : vector<32x8xf32>, vector<8x128xf32>, vector<32x128xf32> -> vector<32x128xf32>
    %c0_4 = arith.constant 0 : index
    %c0_5 = arith.constant 0 : index
    %7 = vector.load %arg3[%c0_4, %c0_5] : memref<8x32xbf16, #tpu.memory_space<vmem>>, vector<8x32xbf16>
    %8 = arith.extf %7 : vector<8x32xbf16> to vector<8x32xf32>
    %c0_6 = arith.constant 0 : index
    %c0_7 = arith.constant 0 : index
    %9 = vector.load %arg14[%c0_6, %c0_7] : memref<8x1xf32, #tpu.memory_space<vmem>>, vector<8x1xf32>
    %cst_8 = arith.constant dense<0.000000e+00> : vector<8xf32>
    %10 = vector.multi_reduction <add>, %8, %cst_8 [1] : vector<8x32xf32> to vector<8xf32>
    %11 = vector.shape_cast %10 : vector<8xf32> to vector<8x1xf32>
    %12 = arith.addf %9, %11 : vector<8x1xf32>
    %c0_9 = arith.constant 0 : index
    %c0_10 = arith.constant 0 : index
    %13 = vector.load %arg14[%c0_9, %c0_10] : memref<8x1xf32, #tpu.memory_space<vmem>>, vector<8x1xf32>
    tpu.vector_store %arg14[%c0_9, %c0_10], %12 {strides = array<i32>} : memref<8x1xf32, #tpu.memory_space<vmem>>, vector<8x1xf32>,
    %cst_11 = arith.constant 1.000000e+00 : f32
    %14 = vector.broadcast %cst_11 : f32 to vector<8x32xf32>
    %15 = arith.subf %14, %8 : vector<8x32xf32>
    %cst_12 = arith.constant -3.000000e+38 : f32
    %16 = vector.broadcast %cst_12 : f32 to vector<8x32xf32>
    %17 = arith.mulf %15, %16 : vector<8x32xf32>
    %18 = vector.shape_cast %6 : vector<32x128xf32> to vector<1x32x128xf32>
    %19 = vector.shape_cast %17 : vector<8x32xf32> to vector<8x32x1xf32>
    %20 = vector.broadcast %18 : vector<1x32x128xf32> to vector<8x32x128xf32>
    %21 = vector.broadcast %19 : vector<8x32x1xf32> to vector<8x32x128xf32>
    %22 = arith.addf %20, %21 : vector<8x32x128xf32>
    %c0_13 = arith.constant 0 : index
    %c0_14 = arith.constant 0 : index
    %23 = vector.load %arg13[%c0_13, %c0_14] : memref<8x128xf32, #tpu.memory_space<vmem>>, vector<8x128xf32>
    %cst_15 = arith.constant dense<0xFF800000> : vector<8x128xf32>
    %24 = vector.multi_reduction <maximumf>, %22, %cst_15 [1] : vector<8x32x128xf32> to vector<8x128xf32>
    %25 = arith.maximumf %23, %24 : vector<8x128xf32>
    %c0_16 = arith.constant 0 : index
    %c0_17 = arith.constant 0 : index
    %26 = vector.load %arg13[%c0_16, %c0_17] : memref<8x128xf32, #tpu.memory_space<vmem>>, vector<8x128xf32>
    tpu.vector_store %arg13[%c0_16, %c0_17], %25 {strides = array<i32>} : memref<8x128xf32, #tpu.memory_space<vmem>>, vector<8x128xf32>,
    %c0_i32_18 = arith.constant 0 : i32
    %27 = arith.cmpi eq, %arg0, %c0_i32_18 : i32
    %28 = arith.extui %27 : i1 to i32
    %c0_i32_19 = arith.constant 0 : i32
    %29 = arith.cmpi ne, %28, %c0_i32_19 : i32
    scf.if %29 {
      %c0_20 = arith.constant 0 : index
      %c0_21 = arith.constant 0 : index
      %30 = vector.load %arg14[%c0_20, %c0_21] : memref<8x1xf32, #tpu.memory_space<vmem>>, vector<8x1xf32>
      %cst_22 = arith.constant 0.000000e+00 : f32
      %31 = vector.broadcast %cst_22 : f32 to vector<8x1xf32>
      %32 = arith.cmpf ogt, %30, %31 : vector<8x1xf32>
      %c0_23 = arith.constant 0 : index
      %c0_24 = arith.constant 0 : index
      %33 = vector.load %arg11[%c0_23, %c0_24] : memref<8x128xf32, #tpu.memory_space<vmem>>, vector<8x128xf32>
      %c0_25 = arith.constant 0 : index
      %c0_26 = arith.constant 0 : index
      %34 = vector.load %arg6[%c0_25, %c0_26] : memref<1x128xf32, #tpu.memory_space<vmem>>, vector<1x128xf32>
      %35 = vector.broadcast %34 : vector<1x128xf32> to vector<8x128xf32>
      %36 = arith.addf %33, %35 : vector<8x128xf32>
      %c0_27 = arith.constant 0 : index
      %c0_28 = arith.constant 0 : index
      %37 = vector.load %arg13[%c0_27, %c0_28] : memref<8x128xf32, #tpu.memory_space<vmem>>, vector<8x128xf32>
      %38 = arith.addf %36, %37 : vector<8x128xf32>
      %cst_29 = arith.constant 0.000000e+00 : f32
      %39 = vector.shape_cast %32 : vector<8x1xi1> to vector<8x1xi1>
      %40 = vector.broadcast %39 : vector<8x1xi1> to vector<8x128xi1>
      %41 = vector.broadcast %cst_29 : f32 to vector<8x128xf32>
      %42 = arith.select %40, %38, %41 : vector<8x128xi1>, vector<8x128xf32>
      %43 = tpu.iota {dimensions = array<i32: 1>} : vector<1x128xi32>
      %c32_i32 = arith.constant 32 : i32
      %44 = vector.broadcast %c32_i32 : i32 to vector<1x128xi32>
      %45 = arith.cmpi slt, %43, %44 : vector<1x128xi32>
      %46 = arith.extui %45 : vector<1x128xi1> to vector<1x128xi32>
      %47 = arith.sitofp %46 : vector<1x128xi32> to vector<1x128xf32>
      %48 = vector.broadcast %47 : vector<1x128xf32> to vector<8x128xf32>
      %49 = arith.mulf %42, %48 : vector<8x128xf32>
      %cst_30 = arith.constant dense<0.000000e+00> : vector<8xf32>
      %50 = vector.multi_reduction <add>, %49, %cst_30 [1] : vector<8x128xf32> to vector<8xf32>
      %51 = vector.shape_cast %50 : vector<8xf32> to vector<8x1xf32>
      %cst_31 = arith.constant 3.125000e-02 : f32
      %52 = vector.broadcast %cst_31 : f32 to vector<8x1xf32>
      %53 = arith.mulf %51, %52 : vector<8x1xf32>
      %54 = vector.broadcast %53 : vector<8x1xf32> to vector<8x128xf32>
      %55 = arith.subf %42, %54 : vector<8x128xf32>
      %56 = vector.broadcast %47 : vector<1x128xf32> to vector<8x128xf32>
      %57 = arith.mulf %55, %56 : vector<8x128xf32>
      %58 = arith.mulf %57, %57 : vector<8x128xf32>
      %cst_32 = arith.constant dense<0.000000e+00> : vector<8xf32>
      %59 = vector.multi_reduction <add>, %58, %cst_32 [1] : vector<8x128xf32> to vector<8xf32>
      %60 = vector.shape_cast %59 : vector<8xf32> to vector<8x1xf32>
      %cst_33 = arith.constant 3.125000e-02 : f32
      %61 = vector.broadcast %cst_33 : f32 to vector<8x1xf32>
      %62 = arith.mulf %60, %61 : vector<8x1xf32>
      %cst_34 = arith.constant 9.99999974E-6 : f32
      %63 = vector.broadcast %cst_34 : f32 to vector<8x1xf32>
      %64 = arith.addf %62, %63 : vector<8x1xf32>
      %65 = math.rsqrt %64 : vector<8x1xf32>
      %66 = vector.broadcast %65 : vector<8x1xf32> to vector<8x128xf32>
      %67 = arith.mulf %57, %66 : vector<8x128xf32>
      %c0_35 = arith.constant 0 : index
      %c0_36 = arith.constant 0 : index
      %68 = vector.load %arg7[%c0_35, %c0_36] : memref<1x128xf32, #tpu.memory_space<vmem>>, vector<1x128xf32>
      %69 = vector.broadcast %68 : vector<1x128xf32> to vector<8x128xf32>
      %70 = arith.mulf %67, %69 : vector<8x128xf32>
      %c0_37 = arith.constant 0 : index
      %c0_38 = arith.constant 0 : index
      %71 = vector.load %arg8[%c0_37, %c0_38] : memref<1x128xf32, #tpu.memory_space<vmem>>, vector<1x128xf32>
      %72 = vector.broadcast %71 : vector<1x128xf32> to vector<8x128xf32>
      %73 = arith.addf %70, %72 : vector<8x128xf32>
      %74 = vector.broadcast %47 : vector<1x128xf32> to vector<8x128xf32>
      %75 = arith.mulf %73, %74 : vector<8x128xf32>
      %c0_39 = arith.constant 0 : index
      %76 = memref.load %arg9[%c0_39] : memref<1xf32, #tpu.memory_space<smem>>
      %cst_40 = arith.constant 0.000000e+00 : f32
      %77 = vector.broadcast %cst_40 : f32 to vector<8x128xf32>
      %78 = arith.cmpf ogt, %75, %77 : vector<8x128xf32>
      %79 = vector.broadcast %76 : f32 to vector<8x128xf32>
      %80 = arith.mulf %79, %75 : vector<8x128xf32>
      %81 = arith.select %78, %75, %80 : vector<8x128xi1>, vector<8x128xf32>
      %c0_41 = arith.constant 0 : index
      %c0_42 = arith.constant 0 : index
      %82 = vector.load %arg10[%c0_41, %c0_42] : memref<8x128xf32, #tpu.memory_space<vmem>>, vector<8x128xf32>
      tpu.vector_store %arg10[%c0_41, %c0_42], %81 {strides = array<i32>} : memref<8x128xf32, #tpu.memory_space<vmem>>, vector<8x128xf32>,
    } else {
    }
    return
  }
  func.func @transform_0(%arg0: i32) -> (i32, i32) {
    %c0_i32 = arith.constant 0 : i32
    %c0_i32_0 = arith.constant 0 : i32
    %c0_i32_1 = arith.constant 0 : i32
    return %c0_i32, %c0_i32_0 : i32, i32
  }
  func.func @transform_1(%arg0: i32) -> (i32, i32) {
    %c0_i32 = arith.constant 0 : i32
    %c0_i32_0 = arith.constant 0 : i32
    return %arg0, %c0_i32 : i32, i32
  }
  func.func @transform_2(%arg0: i32) -> (i32, i32) {
    %c0_i32 = arith.constant 0 : i32
    %c0_i32_0 = arith.constant 0 : i32
    return %c0_i32, %arg0 : i32, i32
  }
  func.func @transform_3(%arg0: i32) -> (i32, i32) {
    %c0_i32 = arith.constant 0 : i32
    %c0_i32_0 = arith.constant 0 : i32
    %c0_i32_1 = arith.constant 0 : i32
    return %c0_i32, %c0_i32_0 : i32, i32
  }
  func.func @transform_4(%arg0: i32) -> (i32, i32) {
    %c0_i32 = arith.constant 0 : i32
    %c0_i32_0 = arith.constant 0 : i32
    %c0_i32_1 = arith.constant 0 : i32
    return %c0_i32, %c0_i32_0 : i32, i32
  }
  func.func @transform_5(%arg0: i32) -> (i32, i32) {
    %c0_i32 = arith.constant 0 : i32
    %c0_i32_0 = arith.constant 0 : i32
    %c0_i32_1 = arith.constant 0 : i32
    return %c0_i32, %c0_i32_0 : i32, i32
  }
  func.func @transform_6(%arg0: i32) -> (i32, i32) {
    %c0_i32 = arith.constant 0 : i32
    %c0_i32_0 = arith.constant 0 : i32
    %c0_i32_1 = arith.constant 0 : i32
    return %c0_i32, %c0_i32_0 : i32, i32
  }
  func.func @transform_7(%arg0: i32) -> (i32, i32) {
    %c0_i32 = arith.constant 0 : i32
    %c0_i32_0 = arith.constant 0 : i32
    %c0_i32_1 = arith.constant 0 : i32
    return %c0_i32, %c0_i32_0 : i32, i32
  }
  func.func @transform_8(%arg0: i32) -> i32 {
    %c0_i32 = arith.constant 0 : i32
    %c0_i32_0 = arith.constant 0 : i32
    return %c0_i32 : i32
  }
  func.func @transform_9(%arg0: i32) -> (i32, i32) {
    %c0_i32 = arith.constant 0 : i32
    %c0_i32_0 = arith.constant 0 : i32
    %c0_i32_1 = arith.constant 0 : i32
    return %c0_i32, %c0_i32_0 : i32, i32
  }
}

</mosaic_0001>

<bundles_post_ra>
// kernel: tpu_custom_call.1
= control target key start
LH: loop header
LB: loop body
LE: loop exit
PB: predicated region body
PF: predicated region fallthrough
CT: control target
= control target key end

     0   :  { %vm44_vm0 = vcmask 1043456   ;;  %vm40_vm1 = vcmask 31744   ;;  %v161_v2 = vlaneseq  ;;  %s858_s0 = inlined_call_operand.vmem [shape: f32[8,4], index: 0, kind: input, shape index: {}]   ;;  %s859_s1 = inlined_call_operand.vmem [shape: bf16[32,8], index: 1, kind: input, shape index: {}]   ;;  %s860_s2 = inlined_call_operand.vmem [shape: bf16[8,32], index: 2, kind: input, shape index: {}]   ;;  %s861_s3 = inlined_call_operand.vmem [shape: f32[4,128], index: 3, kind: input, shape index: {}]   ;;  %s862_s4 = inlined_call_operand.vmem [shape: f32[4,128], index: 4, kind: input, shape index: {}]   ;;  %s863_s5 = inlined_call_operand.vmem [shape: f32[1,128], index: 5, kind: input, shape index: {}]   ;;  %s864_s6 = inlined_call_operand.vmem [shape: f32[1,128], index: 6, kind: input, shape index: {}]   ;;  %s865_s7 = inlined_call_operand.vmem [shape: f32[1,128], index: 7, kind: input, shape index: {}]   ;;  %s866_s8 = inlined_call_operand.<no memory space> [shape: f32[1], index: 8, kind: input, shape index: {}]   ;;  %s867_s9 = inlined_call_operand.hbm [shape: f32[8,128], index: 9, kind: output, shape index: {}]  }
   0x1   :  { %v69_v0 = vld [vmem:[%s862_s4] sm:$0xf] }
   0x2   :  { %v713_v1 = vld [vmem:[%s858_s0] sm:$0xff]  ;;  %571 = vmatpush.msk.msra.mxu1 %vm44_vm0, %v69_v0  ;;  %v722_v4 = vshrl.u32 %v161_v2, 7 }
   0x3   :  { %v148_v3 = vld [vmem:[%s860_s2] sm:$0xf]  ;;  %572 = vmatmul.msk.f32.vlgmr.msra.gmra.mxu1 %vm40_vm1, %v713_v1 }
   0x4   :  { %v149_v5 = vunpack.c.l.bf16 %v148_v3 }
   0x5   :  { %15 = vsyncpa [#allocation8], 0  ;;  %592 = vset.pattern.permute.xlu2 %v722_v4  ;;  %v726_v6 = vadd.s32 8, %v722_v4  ;;  %591 = vset.pattern.permute.xlu0 %v722_v4  ;;  %v735_v11 = vadd.s32 24, %v722_v4  ;;  %v738_v12 = vadd.s32 16, %v722_v4  ;;  %vm151_vm2 = vcmask 261120  }
   0x6   :  { %v158_v7 = vsub.f32 1.0, %v149_v5  ;;  %v152_v14 = vsel %vm151_vm2, %v149_v5, 0.0  ;;  %v579_v18 = vld [vmem:[%s859_s1] sm:$0xff]   ;;  %v586_v19 = vld [vmem:[%s859_s1 + $0x8] sm:$0xff]   ;;  %vm106_vm3 = vcmask 64512   ;;  %vm95_vm4 = vcmask 7168  }
   0x7   :  { %593 = vset.pattern.permute.xlu1 %v726_v6  ;;  %153 = vadd.xlane.f32.xlu0 %v152_v14  ;;  %v580_v20 = vunpack.c.l.bf16 %v579_v18  ;;  %v584_v21 = vunpack.c.l.bf16 %v586_v19  ;;  %v581_v23 = vunpack.c.h.bf16 %v579_v18  ;;  %v585_v24 = vunpack.c.h.bf16 %v586_v19  ;;  %v39_v27 = vld [vmem:[%s861_s3] sm:$0xf]  ;;  %s656_s23 = smov [#allocation7]  }
   0x8   :  { %v730_v8 = vmul.f32 -3e+38, %v158_v7  ;;  %569 = vmatpush.msk.msra.mxu0 %vm44_vm0, %v39_v27  ;;  %v654_v30 = vmov 0.0   ;;  %v655_v37 = vmov 0   ;;  %vm473_vm6 = vcmask 1041409   ;;  %s558_s24 = sshll.u32 %s656_s23, 4  ;;  %s559_s24 = int_to_ptr.vmem [resolvable:$true] %s558_s24 }
   0x9   :  { %570 = vmatmul.msk.f32.vlgmr.msra.gmra.mxu0 %vm40_vm1, %v713_v1  ;;  %96 = vst.msk [vmem:[#allocation5] sm:$0xff] %vm95_vm4, %v654_v30  ;;  %vm475_vm7 = vcmask 1042434   ;;  %vm477_vm8 = vcmask 1043459   ;;  %vm479_vm9 = vcmask 1044484   ;;  %vm481_vm10 = vcmask 1045509  }
   0xa   :  { %v185_v9 = vperm.slane %v730_v8, 1  ;;  %v160_v10 = vperm.slane %v730_v8, 0  ;;  %v210_v13 = vperm.slane %v730_v8, 2  ;;  %v235_v15 = vperm.slane %v730_v8, 3 }
   0xb   :  { %v260_v16 = vperm.slane %v730_v8, 4  ;;  %v285_v17 = vperm.slane %v730_v8, 5  ;;  %v310_v25 = vperm.slane %v730_v8, 6  ;;  %v335_v26 = vperm.slane %v730_v8, 7 }
   0xc   :  { %vm483_vm11 = vcmask 1046534   ;;  %vm485_vm12 = vcmask 1047559  }
   0xd   :  { %190 = vperm.xlu2 %592, %v185_v9  }
   0xf   :  { %171 = vperm.xlu1 %593, %v160_v10  }
  0x10   :  { %v150_v32 = vld [vmem:[#allocation5] sm:$0xff] }
  0x15   :  { %595 = vset.pattern.permute.xlu2 %v735_v11 }
  0x17   :  { %594 = vset.pattern.permute.xlu1 %v738_v12 }
  0x1b   :  { %165 = vperm.xlu0 %591, %v160_v10  }
  0x1d   :  { %183 = vperm.xlu2 %595, %v160_v10  }
  0x1f   :  { %177 = vperm.xlu1 %594, %v160_v10  }
  0x23   :  { %603 = vset.pattern.permute.xlu0 %v726_v6 }
  0x25   :  { %597 = vset.pattern.permute.xlu2 %v722_v4 }
  0x27   :  { %596 = vset.pattern.permute.xlu1 %v726_v6 }
  0x2b   :  { %271 = vperm.xlu0 %603, %v260_v16  }
  0x2d   :  { %215 = vperm.xlu2 %597, %v210_v13  }
  0x2f   :  { %196 = vperm.xlu1 %596, %v185_v9  }
  0x33   :  { %612 = vset.pattern.permute.xlu0 %v738_v12 }
  0x35   :  { %598 = vset.pattern.permute.xlu2 %v738_v12 }
  0x37   :  { %221 = vperm.xlu1 %596, %v210_v13  }
  0x3b   :  { %302 = vperm.xlu0 %612, %v285_v17  }
  0x3d   :  { %202 = vperm.xlu2 %598, %v185_v9  }
  0x3f   :  { %599 = vset.pattern.permute.xlu1 %v722_v4 }
  0x43   :  { %613 = vset.pattern.permute.xlu0 %v735_v11 }
  0x45   :  { %600 = vset.pattern.permute.xlu2 %v726_v6 }
  0x47   :  { %240 = vperm.xlu1 %599, %v235_v15  }
  0x4b   :  { %233 = vperm.xlu0 %613, %v210_v13  }
  0x4d   :  { %246 = vperm.xlu2 %600, %v235_v15  }
  0x4f   :  { %601 = vset.pattern.permute.xlu1 %v738_v12 }
  0x53   :  { %308 = vperm.xlu0 %613, %v285_v17  }
  0x55   :  { %602 = vset.pattern.permute.xlu2 %v722_v4 }
  0x57   :  { %227 = vperm.xlu1 %601, %v210_v13  }
  0x5b   :  { %622 = vset.pattern.permute.xlu0 %v655_v37 }
  0x5d   :  { %265 = vperm.xlu2 %602, %v260_v16  }
  0x5f   :  { %604 = vset.pattern.permute.xlu1 %v735_v11 }
  0x65   :  { %605 = vset.pattern.permute.xlu2 %v738_v12 }
  0x67   :  { %208 = vperm.xlu1 %604, %v185_v9   ;;  %v191_v28 = vpop.permute.xlu2 %190 }
  0x6d   :  { %252 = vperm.xlu2 %605, %v235_v15  }
  0x6f   :  { %606 = vset.pattern.permute.xlu1 %v722_v4 }
  0x75   :  { %607 = vset.pattern.permute.xlu2 %v726_v6 }
  0x77   :  { %290 = vperm.xlu1 %606, %v285_v17   ;;  %v184_v29 = vpop.permute.xlu2 %183 }
  0x7a   :  { %v154_v31 = vpop.xlane.xlu0 %153 }
  0x7b   :  { %v155_v34 = vadd.f32 %v154_v31, %v150_v32 }
  0x7d   :  { %296 = vperm.xlu2 %607, %v285_v17   ;;  %157 = vst.msk [vmem:[#allocation5] sm:$0xff] %vm95_vm4, %v155_v34 }
  0x7f   :  { %608 = vset.pattern.permute.xlu1 %v738_v12 }
  0x80   :  { %v90_v22 = vpop.f32.mrf.mxu1 }
  0x81   :  { %134 = vmatpush.msra.mxu2 %v90_v22  ;;  %587 = vmatpush.msra.mxu3 %v90_v22  ;;  %v172_v35 = vpop.permute.xlu1 %171 }
  0x82   :  { %573 = vmatmul.msk.f32.vlgmr.msra.gmra.mxu2 %vm106_vm3, %v580_v20  ;;  %575 = vmatmul.msk.f32.vlgmr.msra.gmra.mxu3 %vm106_vm3, %v584_v21 }
  0x84   :  { %v493_v38 = vld [vmem:[#allocation5] sm:$0xff] }
  0x85   :  { %609 = vset.pattern.permute.xlu2 %v722_v4  ;;  %vm494_vm5 = vcmp.gt.f32.partialorder %v493_v38, 0.0 }
  0x86   :  { %v503_v39 = vsel %vm494_vm5, 1, %v655_v37 }
  0x87   :  { %277 = vperm.xlu1 %608, %v260_v16   ;;  %v216_v33 = vpop.permute.xlu2 %215 }
  0x8a   :  { %574 = vmatmul.msk.f32.gmra.mxu2 %vm106_vm3, %v581_v23  ;;  %576 = vmatmul.msk.f32.gmra.mxu3 %vm106_vm3, %v585_v24 }
  0x8d   :  { %315 = vperm.xlu2 %609, %v310_v25   ;;  %v166_v44 = vpop.permute.xlu0 %165 }
  0x8f   :  { %610 = vset.pattern.permute.xlu1 %v726_v6 }
  0x91   :  { %v178_v40 = vpop.permute.xlu1 %177 }
  0x95   :  { %611 = vset.pattern.permute.xlu2 %v735_v11 }
  0x97   :  { %321 = vperm.xlu1 %610, %v310_v25   ;;  %v203_v36 = vpop.permute.xlu2 %202 }
  0x9d   :  { %258 = vperm.xlu2 %611, %v235_v15   ;;  %v788_v48 = vpop.permute.xlu0 %271 }
  0x9f   :  { %614 = vset.pattern.permute.xlu1 %v722_v4 }
  0xa1   :  { %v197_v42 = vpop.permute.xlu1 %196 }
  0xa5   :  { %615 = vset.pattern.permute.xlu2 %v726_v6 }
  0xa7   :  { %340 = vperm.xlu1 %614, %v335_v26   ;;  %v247_v41 = vpop.permute.xlu2 %246 }
  0xa9   :  { %v222_v45 = vpop.permute.xlu1 %221 }
  0xad   :  { %346 = vperm.xlu2 %615, %v335_v26   ;;  %v792_v51 = vpop.permute.xlu0 %302 }
  0xaf   :  { %616 = vset.pattern.permute.xlu1 %v735_v11 }
  0xb5   :  { %617 = vset.pattern.permute.xlu2 %v738_v12 }
  0xb7   :  { %283 = vperm.xlu1 %616, %v260_v16   ;;  %v786_v43 = vpop.permute.xlu2 %265 }
  0xb9   :  { %v241_v47 = vpop.permute.xlu1 %240 }
  0xbd   :  { %327 = vperm.xlu2 %617, %v310_v25   ;;  %v234_v59 = vpop.permute.xlu0 %233 }
  0xbf   :  { %618 = vset.pattern.permute.xlu1 %v738_v12 }
  0xc5   :  { %619 = vset.pattern.permute.xlu2 %v735_v11 }
  0xc7   :  { %352 = vperm.xlu1 %618, %v335_v26   ;;  %v253_v46 = vpop.permute.xlu2 %252 }
  0xc9   :  { %v228_v50 = vpop.permute.xlu1 %227 }
  0xcd   :  { %333 = vperm.xlu2 %619, %v310_v25  }
  0xcf   :  { %620 = vset.pattern.permute.xlu1 %v735_v11 }
  0xd5   :  { %621 = vset.pattern.permute.xlu2 %v655_v37 }
  0xd6   :  { %505 = vperm.xlu2 %621, %v503_v39  }
  0xd7   :  { %358 = vperm.xlu1 %620, %v335_v26   ;;  %v790_v49 = vpop.permute.xlu2 %296 }
  0xd9   :  { %v209_v55 = vpop.permute.xlu1 %208 }
  0xe7   :  { %v794_v52 = vpop.permute.xlu2 %315 }
  0xe9   :  { %v291_v11 = vpop.permute.xlu1 %290 }
  0xf7   :  { %v259_v0 = vpop.permute.xlu2 %258 }
  0xf9   :  { %v278_v32 = vpop.permute.xlu1 %277 }
 0x105   :  { %v796_v53 = vpop.f32.mrf.mxu2  ;;  %v798_v54 = vpop.f32.mrf.mxu3 }
 0x106   :  { %v362_v56 = vadd.f32 %v178_v40, %v798_v54  ;;  %v360_v57 = vadd.f32 %v166_v44, %v796_v53  ;;  %v366_v58 = vadd.f32 %v203_v36, %v798_v54  ;;  %v364_v61 = vadd.f32 %v191_v28, %v796_v53 }
 0x107   :  { %v368_v62 = vadd.f32 %v216_v33, %v796_v53  ;;  %v372_v63 = vadd.f32 %v241_v47, %v796_v53  ;;  %v370_v7 = vadd.f32 %v228_v50, %v798_v54  ;;  %v374_v8 = vadd.f32 %v253_v46, %v798_v54 }
 0x10d   :  { %v803_v60 = vpop.f32.mrf.mxu2  ;;  %v812_v6 = vpop.f32.mrf.mxu3 }
 0x10e   :  { %v361_v1 = vadd.f32 %v172_v35, %v803_v60  ;;  %v365_v3 = vadd.f32 %v197_v42, %v803_v60  ;;  %v369_v4 = vadd.f32 %v222_v45, %v803_v60  ;;  %v373_v5 = vadd.f32 %v247_v41, %v803_v60 }
 0x10f   :  { %v371_v9 = vadd.f32 %v234_v59, %v812_v6  ;;  %v375_v10 = vadd.f32 %v259_v0, %v812_v6  ;;  %v363_v16 = vadd.f32 %v184_v29, %v812_v6  ;;  %v367_v17 = vadd.f32 %v209_v55, %v812_v6  ;;  %v322_v55 = vpop.permute.xlu1 %321  ;;  %v347_v0 = vpop.permute.xlu2 %346 }
 0x110   :  { %v393_v12 = vmax.f32 %v360_v57, %v361_v1  ;;  %v402_v13 = vmax.f32 %v364_v61, %v365_v3  ;;  %v411_v14 = vmax.f32 %v368_v62, %v369_v4  ;;  %v420_v15 = vmax.f32 %v372_v63, %v373_v5 }
 0x111   :  { %v377_v3 = vadd.f32 %v788_v48, %v803_v60  ;;  %v376_v4 = vadd.f32 %v786_v43, %v796_v53  ;;  %v381_v5 = vadd.f32 %v790_v49, %v803_v60  ;;  %v309_v48 = vpop.permute.xlu0 %308  ;;  %v385_v43 = vadd.f32 %v322_v55, %v803_v60 }
 0x112   :  { %v394_v18 = vmax.f32 %v393_v12, %v362_v56  ;;  %v403_v19 = vmax.f32 %v402_v13, %v366_v58  ;;  %v412_v20 = vmax.f32 %v411_v14, %v370_v7  ;;  %v421_v21 = vmax.f32 %v420_v15, %v374_v8 }
 0x113   :  { %v378_v12 = vadd.f32 %v278_v32, %v798_v54  ;;  %v382_v14 = vadd.f32 %v792_v51, %v798_v54  ;;  %v383_v49 = vadd.f32 %v309_v48, %v812_v6 }
 0x114   :  { %v395_v22 = vmax.f32 %v394_v18, %v363_v16  ;;  %v404_v23 = vmax.f32 %v403_v19, %v367_v17  ;;  %v413_v24 = vmax.f32 %v412_v20, %v371_v9  ;;  %v422_v25 = vmax.f32 %v421_v21, %v375_v10 }
 0x115   :  { %v429_v9 = vmax.f32 %v376_v4, %v377_v3  ;;  %v380_v10 = vadd.f32 %v291_v11, %v796_v53  ;;  %v384_v11 = vadd.f32 %v794_v52, %v796_v53 }
 0x116   :  { %v396_v26 = vrot.slane %v395_v22, 4  ;;  %v405_v27 = vrot.slane %v404_v23, 4  ;;  %v414_v28 = vrot.slane %v413_v24, 4  ;;  %v423_v31 = vrot.slane %v422_v25, 4 }
 0x117   :  { %v328_v7 = vpop.permute.xlu2 %327  ;;  %v438_v15 = vmax.f32 %v380_v10, %v381_v5  ;;  %v430_v16 = vmax.f32 %v429_v9, %v378_v12  ;;  %v447_v21 = vmax.f32 %v384_v11, %v385_v43 }
 0x118   :  { %v397_v33 = vmax.f32 %v395_v22, %v396_v26  ;;  %v406_v34 = vmax.f32 %v404_v23, %v405_v27  ;;  %v415_v35 = vmax.f32 %v413_v24, %v414_v28  ;;  %v424_v36 = vmax.f32 %v422_v25, %v423_v31 }
 0x119   :  { %v341_v1 = vpop.permute.xlu1 %340  ;;  %v439_v18 = vmax.f32 %v438_v15, %v382_v14  ;;  %v386_v20 = vadd.f32 %v328_v7, %v798_v54 }
 0x11a   :  { %v398_v29 = vrot.slane %v397_v33, 2  ;;  %v407_v37 = vrot.slane %v406_v34, 2  ;;  %v416_v38 = vrot.slane %v415_v35, 2  ;;  %v425_v39 = vrot.slane %v424_v36, 2 }
 0x11b   :  { %v440_v51 = vmax.f32 %v439_v18, %v383_v49  ;;  %v448_v24 = vmax.f32 %v447_v21, %v386_v20 }
 0x11c   :  { %v399_v40 = vmax.f32 %v397_v33, %v398_v29  ;;  %v408_v41 = vmax.f32 %v406_v34, %v407_v37  ;;  %v417_v42 = vmax.f32 %v415_v35, %v416_v38  ;;  %v426_v44 = vmax.f32 %v424_v36, %v425_v39 }
 0x11d   :  { %v441_v27 = vrot.slane %v440_v51, 4  ;;  %v389_v33 = vadd.f32 %v347_v0, %v803_v60  ;;  %v388_v35 = vadd.f32 %v341_v1, %v796_v53  ;;  %v510_v1 = vand.u32 127, %v161_v2 }
 0x11e   :  { %v400_v45 = vrot.slane %v399_v40, 1  ;;  %v409_v46 = vrot.slane %v408_v41, 1  ;;  %v418_v47 = vrot.slane %v417_v42, 1  ;;  %v427_v50 = vrot.slane %v426_v44, 1 }
 0x11f   :  { %v442_v34 = vmax.f32 %v440_v51, %v441_v27  ;;  %v456_v38 = vmax.f32 %v388_v35, %v389_v33  ;;  %vm511_vm13 = vcmp.lt.s32.totalorder %v510_v1, 32 }
 0x120   :  { %v401_v56 = vmax.f32 %v399_v40, %v400_v45  ;;  %v410_v57 = vmax.f32 %v408_v41, %v409_v46  ;;  %v419_v58 = vmax.f32 %v417_v42, %v418_v47  ;;  %v428_v59 = vmax.f32 %v426_v44, %v427_v50 }
 0x121   :  { %v443_v37 = vrot.slane %v442_v34, 2  ;;  %v577_v12 = vsel %vm511_vm13, 1.0, %v654_v30 }
 0x122   :  { %v474_v61 = vsel %vm473_vm6, %v410_v57, %v401_v56 }
 0x123   :  { %v476_v62 = vsel %vm475_vm7, %v419_v58, %v474_v61  ;;  %v444_v45 = vmax.f32 %v442_v34, %v443_v37 }
 0x124   :  { %v478_v63 = vsel %vm477_vm8, %v428_v59, %v476_v62  ;;  %v65_v62 = vpop.f32.mrf.mxu0 }
 0x125   :  { %v445_v55 = vrot.slane %v444_v45, 1 }
 0x127   :  { %v334_v19 = vpop.permute.xlu2 %333  ;;  %v446_v58 = vmax.f32 %v444_v45, %v445_v55 }
 0x128   :  { %v387_v22 = vadd.f32 %v334_v19, %v812_v6 }
 0x129   :  { %v284_v8 = vpop.permute.xlu1 %283 }
 0x12a   :  { %v379_v13 = vadd.f32 %v284_v8, %v812_v6  ;;  %v449_v25 = vmax.f32 %v448_v24, %v387_v22 }
 0x12c   :  { %v431_v17 = vmax.f32 %v430_v16, %v379_v13  ;;  %v450_v31 = vrot.slane %v449_v25, 4 }
 0x12e   :  { %v432_v23 = vrot.slane %v431_v17, 4  ;;  %v451_v36 = vmax.f32 %v449_v25, %v450_v31  ;;  %v625_v25 = vld [vmem:[%s865_s7] ss:$0 sm:$0xff] }
 0x130   :  { %v433_v26 = vmax.f32 %v431_v17, %v432_v23  ;;  %v452_v42 = vrot.slane %v451_v36, 2  ;;  %v506_v8 = vpop.permute.xlu2 %505  ;;  %v624_v23 = vld [vmem:[%s864_s6] ss:$0 sm:$0xff]  ;;  %s560_s6 = sshll.u32 %s867_s9, 4  ;;  %s561_s6 = int_to_ptr.hbm [resolvable:$true] %s560_s6 }
 0x131   :  { %vm507_vm14 = vcmp.eq.s32.totalorder %v506_v8, 1 }
 0x132   :  { %v434_v32 = vrot.slane %v433_v26, 2  ;;  %v453_v50 = vmax.f32 %v451_v36, %v452_v42 }
 0x134   :  { %v435_v29 = vmax.f32 %v433_v26, %v434_v32 }
 0x136   :  { %v436_v44 = vrot.slane %v435_v29, 1 }
 0x138   :  { %v437_v60 = vmax.f32 %v435_v29, %v436_v44 }
 0x139   :  { %v353_v28 = vpop.permute.xlu1 %352 }
 0x13a   :  { %v390_v52 = vadd.f32 %v353_v28, %v798_v54  ;;  %v454_v54 = vrot.slane %v453_v50, 1  ;;  %v480_v57 = vsel %vm479_vm9, %v437_v60, %v478_v63  ;;  %v549_v28 = vstv %s866_s8 }
 0x13b   :  { %v482_v0 = vsel %vm481_vm10, %v446_v58, %v480_v57 }
 0x13c   :  { %v457_v40 = vmax.f32 %v456_v38, %v390_v52  ;;  %v455_v3 = vmax.f32 %v453_v50, %v454_v54 }
 0x13e   :  { %v484_v5 = vsel %vm483_vm11, %v455_v3, %v482_v0 }
 0x149   :  { %v359_v39 = vpop.permute.xlu1 %358 }
 0x14a   :  { %v391_v41 = vadd.f32 %v359_v39, %v812_v6  ;;  %v623_v6 = vld [vmem:[%s863_s5] ss:$0 sm:$0xff] }
 0x14b   :  { %v500_v7 = vadd.f32 %v623_v6, %v65_v62 }
 0x14c   :  { %v458_v46 = vmax.f32 %v457_v40, %v391_v41 }
 0x14e   :  { %v459_v47 = vrot.slane %v458_v46, 4 }
 0x150   :  { %v460_v56 = vmax.f32 %v458_v46, %v459_v47 }
 0x152   :  { %v461_v53 = vrot.slane %v460_v56, 2 }
 0x154   :  { %v462_v59 = vmax.f32 %v460_v56, %v461_v53 }
 0x156   :  { %v463_v61 = vrot.slane %v462_v59, 1 }
 0x158   :  { %v464_v4 = vmax.f32 %v462_v59, %v463_v61 }
 0x15a   :  { %v486_v63 = vsel %vm485_vm12, %v464_v4, %v484_v5 }
 0x15b   :  { %v488_v9 = vmax.f32 %v486_v63, -3e+38 }
 0x15d   :  { %v502_v10 = vadd.f32 %v500_v7, %v488_v9 }
 0x15f   :  { %v508_v13 = vsel %vm507_vm14, %v502_v10, 0.0 }
 0x160   :  { %v514_v14 = vmul.f32 %v577_v12, %v508_v13 }
 0x162   :  { %515 = vadd.xlane.f32.xlu0 %v514_v14 }
 0x1d5   :  { %v516_v15 = vpop.xlane.xlu0 %515 }
 0x1d6   :  { %v517_v48 = vmul.f32 0.03125, %v516_v15 }
 0x1d8   :  { %v518_v16 = vsub.f32 %v508_v13, %v517_v48 }
 0x1da   :  { %v519_v2 = vmul.f32 %v577_v12, %v518_v16 }
 0x1dc   :  { %v520_v43 = vmul.f32 %v519_v2, %v519_v2 }
 0x1de   :  { %521 = vadd.xlane.f32.xlu1 %v520_v43 }
 0x251   :  { %v522_v17 = vpop.xlane.xlu1 %521 }
 0x252   :  { %v523_v49 = vmul.f32 0.03125, %v522_v17 }
 0x254   :  { %v524_v18 = vadd.f32 1e-05, %v523_v49 }
 0x256   :  { %626 = vrsqrt.f32 %v524_v18  ;;  %vm531_vm0 = vweird.f32 %v524_v18 }
 0x25c   :  { %v627_v19 = vpop.eup %626 }
 0x25d   :  { %v526_v11 = vmul.f32 %v627_v19, %v524_v18  ;;  %vm532_vm15 = vweird.f32 %v627_v19 }
 0x25e   :  { %vm533_vm1 = vmor %vm531_vm0, %vm532_vm15 }
 0x25f   :  { %v527_v20 = vmul.f32 %v627_v19, %v526_v11 }
 0x261   :  { %v528_v21 = vmul.f32 0.5, %v527_v20 }
 0x263   :  { %v529_v22 = vsub.f32 1.5, %v528_v21 }
 0x265   :  { %v530_v30 = vmul.f32 %v627_v19, %v529_v22 }
 0x267   :  { %v534_v51 = vsel %vm533_vm1, %v627_v19, %v530_v30 }
 0x268   :  { %v535_v24 = vmul.f32 %v534_v51, %v519_v2 }
 0x26a   :  { %v540_v26 = vmul.f32 %v624_v23, %v535_v24 }
 0x26c   :  { %v545_v27 = vadd.f32 %v625_v25, %v540_v26 }
 0x26e   :  { %v546_v31 = vmul.f32 %v577_v12, %v545_v27 }
 0x270   :  { %vm548_vm2 = vcmp.gt.f32.partialorder %v546_v31, 0.0  ;;  %v550_v32 = vmul.f32 %v549_v28, %v546_v31 }
 0x272   :  { %v551_v33 = vsel %vm548_vm2, %v546_v31, %v550_v32 }
 0x273   :  { %552 = vst [vmem:[#allocation7] sm:$0xff] %v551_v33 }
 0x274   :  { %563 = dma.vmem_to_hbm [thread:$0]  %s559_s24, 128, %s561_s6, [#allocation8]  }
 0x275   :  { %652 = dma.done.wait [#allocation8], 128  }
 0x276   :  { %653 = vsyncadd [#allocation8], 4294967168 }
 0x277   :  { %568 = vsyncpa [#allocation8], 1 }

</bundles_post_ra>
